<compile_context>
chip_gen: v7x
topology: tpu7x:2x2x1
jax: 0.10.0
libtpu: 0.0.40
codegen_flags: <defaults>
</compile_context>

<pallas_src>
import functools

import jax
import jax.numpy as jnp
from jax.experimental import pallas as pl
from jax.experimental.pallas import tpu as pltpu


# -----------------------------------------------------------------------------
# Fused kernel
# -----------------------------------------------------------------------------
def _fused_mask_kernel(x_ref, w_ref, b_ref,
                       soft_ref, hard_ref, dil_ref, cnt_h_ref, cnt_d_ref,
                       acc_ref, *, width, c_block):
    # x_ref    : (Bt, Ck, HW) VMEM, native dtype (bf16/f32)
    # w_ref    : (Ck, 1)      VMEM f32  (Conv2d(channels, 1, k=1) weight slice)
    # b_ref    : (1,)         SMEM f32  (conv bias)
    # soft_ref : (Bt, 1, HW)  VMEM f32
    # hard_ref : (Bt, 1, HW)  VMEM f32
    # dil_ref  : (Bt, 1, HW)  VMEM bf16
    # cnt_*    : (1, 1, 1)    VMEM f32  per-batch-block active counts
    # acc_ref  : (Bt, 8, HW)  VMEM f32  per-(channel mod 8) partial sums
    k = pl.program_id(1)
    nk = pl.num_programs(1)

    @pl.when(k == 0)
    def _init():
        acc_ref[...] = jnp.zeros_like(acc_ref)

    # --- channel-slab FMA: dense (Bt, 8, HW) loads, (8,1) broadcast weights ---
    # Partial sums stay per-sublane; the single cross-sublane reduce happens in
    # the epilogue (XLU, otherwise idle here).
    for s in range(0, c_block, 8):
        chunk = min(8, c_block - s)
        xs = x_ref[:, s:s + chunk, :].astype(jnp.float32)   # (Bt, chunk, HW)
        ws = w_ref[s:s + chunk, :].astype(jnp.float32)      # (chunk, 1)
        acc_ref[:, 0:chunk, :] += xs * ws

    @pl.when(k == nk - 1)
    def _epilogue():
        # one cross-sublane reduce over the 8 partial-sum rows, then bias
        soft = jnp.sum(acc_ref[...], axis=1) + b_ref[0]      # (Bt, HW) f32
        soft_ref[:, 0, :] = soft

        # eval-mode Gumbel: hard = (soft >= 0)
        hard = (soft >= 0.0).astype(jnp.float32)
        hard_ref[:, 0, :] = hard

        # fused ExpandMask: 3x3 all-ones conv, padding=1, stride=1, > 0.5
        # Separable OR (max) via lane rotations; iota edge masks suppress row
        # wrap (horizontal) and image wrap (vertical) = zero padding.
        hw = soft.shape[-1]
        idx = jax.lax.broadcasted_iota(jnp.int32, hard.shape, 1)   # (Bt, HW)
        col = idx % width
        left = jnp.where(col == 0, 0.0, pltpu.roll(hard, shift=1, axis=1))
        right = jnp.where(col == width - 1, 0.0,
                          pltpu.roll(hard, shift=hw - 1, axis=1))
        horiz = jnp.maximum(hard, jnp.maximum(left, right))
        up = jnp.where(idx < width, 0.0,
                       pltpu.roll(horiz, shift=width, axis=1))
        down = jnp.where(idx >= hw - width, 0.0,
                         pltpu.roll(horiz, shift=hw - width, axis=1))
        dil = jnp.maximum(horiz, jnp.maximum(up, down))
        dil_ref[:, 0, :] = dil.astype(dil_ref.dtype)

        # per-block active counts (lane reduce then sublane reduce)
        h_cnt = jnp.sum(jnp.sum(hard, axis=1, keepdims=True),
                        axis=0, keepdims=True)               # (1, 1)
        d_cnt = jnp.sum(jnp.sum(dil, axis=1, keepdims=True),
                        axis=0, keepdims=True)               # (1, 1)
        cnt_h_ref[...] = h_cnt.reshape(1, 1, 1)
        cnt_d_ref[...] = d_cnt.reshape(1, 1, 1)


# -----------------------------------------------------------------------------
# Tiling heuristics
# -----------------------------------------------------------------------------
def _pick_batch_tile(batch):
    # Prefer the largest sublane packing (<= 8 images per block) that still
    # leaves >= 2 parallel grid steps (v7x has 2 TensorCores); otherwise the
    # largest divisor <= 8.
    for bt in (8, 4, 2, 1):
        if batch % bt == 0 and batch // bt >= 2:
            return bt
    for bt in (8, 4, 2, 1):
        if batch % bt == 0:
            return bt
    return 1


def _pick_channel_tile(channels):
    # Cap the channel block at 256 so the double-buffered (Bt, Ck, HW) input
    # and the f32 slab temporaries stay well inside v7x's scoped VMEM even at
    # production spatial sizes. Blocks < C must be a multiple of 8.
    if channels <= 256:
        return channels
    for ck in range(256, 7, -8):
        if channels % ck == 0:
            return ck
    return channels


# -----------------------------------------------------------------------------
# Wrapper
# -----------------------------------------------------------------------------
@jax.jit
def _mask_unit_kernels(x, maskconv_w, maskconv_b):
    B, C, H, W = x.shape
    HW = H * W
    x_r = x.reshape(B, C, HW)                               # native dtype, no cast
    w_col = maskconv_w.reshape(C, 1).astype(jnp.float32)    # Conv2d weight [1,C,1,1]
    b_r = maskconv_b.reshape(1).astype(jnp.float32)         # Conv2d bias [1]

    bt = _pick_batch_tile(B)
    ck = _pick_channel_tile(C)
    nb = B // bt
    nk = C // ck

    kernel = functools.partial(_fused_mask_kernel, width=W, c_block=ck)

    soft, hard, dil, cnt_h, cnt_d = pl.pallas_call(
        kernel,
        grid=(nb, nk),
        in_specs=[
            pl.BlockSpec((bt, ck, HW), lambda i, k: (i, k, 0)),
            pl.BlockSpec((ck, 1), lambda i, k: (k, 0)),
            pl.BlockSpec(memory_space=pltpu.MemorySpace.SMEM),
        ],
        out_specs=[
            pl.BlockSpec((bt, 1, HW), lambda i, k: (i, 0, 0)),
            pl.BlockSpec((bt, 1, HW), lambda i, k: (i, 0, 0)),
            pl.BlockSpec((bt, 1, HW), lambda i, k: (i, 0, 0)),
            pl.BlockSpec((1, 1, 1), lambda i, k: (i, 0, 0)),
            pl.BlockSpec((1, 1, 1), lambda i, k: (i, 0, 0)),
        ],
        out_shape=[
            jax.ShapeDtypeStruct((B, 1, HW), jnp.float32),    # soft (conv out)
            jax.ShapeDtypeStruct((B, 1, HW), jnp.float32),    # hard 0/1
            jax.ShapeDtypeStruct((B, 1, HW), jnp.bfloat16),   # dilated 0/1
            jax.ShapeDtypeStruct((nb, 1, 1), jnp.float32),    # sum(hard) / block
            jax.ShapeDtypeStruct((nb, 1, 1), jnp.float32),    # sum(dil)  / block
        ],
        scratch_shapes=[pltpu.VMEM((bt, 8, HW), jnp.float32)],
        compiler_params=pltpu.CompilerParams(
            dimension_semantics=("parallel", "arbitrary")),
    )(x_r, w_col, b_r)

    return (soft.reshape(B, 1, H, W),
            hard.reshape(B, 1, H, W),
            dil.reshape(B, 1, H, W),
            jnp.sum(cnt_h),
            jnp.sum(cnt_d))


def _make_active_positions_list(mask_flat_bool, size):
    # torch.nonzero(...).squeeze(1).int() is dynamic-shape; emitted here as a
    # fixed-size (padded with -1) int32 vector in plain JAX (bookkeeping glue).
    # TODO(synk): no clean Pallas equivalent for dynamic-shape stream compaction.
    idx, = jnp.nonzero(mask_flat_bool, size=size, fill_value=-1)
    return idx.astype(jnp.int32)


def mask_unit_forward(x, maskconv_w, maskconv_b, meta):
    """Reproduces MaskUnit.forward (eval-mode Gumbel)."""
    soft, hard, dil, n_hard, n_dil = _mask_unit_kernels(x, maskconv_w, maskconv_b)
    B, _, H, W = soft.shape
    total = B * 1 * H * W

    hard_dilate = dil > 0.5                                 # bool, like torch '> 0.5'

    mask = {
        "hard": hard,                                       # float 0/1, (B,1,H,W)
        "soft": soft,                                       # conv output, (B,1,H,W)
        "active_positions": n_hard,                         # in-kernel count
        "total_positions": total,
        "active_positions_list": _make_active_positions_list(
            hard.reshape(-1) > 0.5, total),
        "active_positions_list_inverted": None,
        "flops_per_position": 0,
    }

    dil_flat = hard_dilate.reshape(-1)
    # masked_scatter_ of arange == exclusive-cumsum rank at active positions;
    # inactive positions hold arbitrary values (matches torch.empty semantics).
    inv = (jnp.cumsum(dil_flat.astype(jnp.int32)) - 1).reshape(hard_dilate.shape)
    mask_dilate = {
        "hard": hard_dilate,                                # bool, (B,1,H,W)
        "soft": None,
        "active_positions": n_dil,                          # in-kernel count
        "total_positions": total,
        "active_positions_list": _make_active_positions_list(dil_flat, total),
        "active_positions_list_inverted": inv.astype(jnp.int32),
        "flops_per_position": 0,
    }

    m = {"std": mask, "dilate": mask_dilate}
    if meta.get("save_masks", False):
        meta["masks"].append(m)
    return m, meta


# -----------------------------------------------------------------------------
# Test
# -----------------------------------------------------------------------------
def _run_case(B, C, H, W, x_dtype, key):
    kx, kw, kb = jax.random.split(key, 3)
    x = jax.random.normal(kx, (B, C, H, W), dtype=jnp.float32).astype(x_dtype)
    # nn.Conv2d(channels, 1, kernel_size=1): weight [1, C, 1, 1], bias [1]
    maskconv_w = jax.random.normal(kw, (1, C, 1, 1), dtype=jnp.float32) * 0.5
    maskconv_b = jax.random.normal(kb, (1,), dtype=jnp.float32) * 0.1

    meta = {"gumbel_temp": 1.0, "gumbel_noise": False,
            "save_masks": True, "masks": []}
    m, meta = mask_unit_forward(x, maskconv_w, maskconv_b, meta)
    jax.block_until_ready(m["std"]["soft"])
    jax.block_until_ready(m["dilate"]["hard"])

    soft = m["std"]["soft"]
    hard = m["std"]["hard"]
    dil = m["dilate"]["hard"]

    # 1x1 conv reference (same bf16/f32 inputs, f32 math).
    soft_ref = (jnp.einsum("bchw,c->bhw", x.astype(jnp.float32),
                           maskconv_w[0, :, 0, 0]) + maskconv_b[0])[:, None]
    assert jnp.allclose(soft, soft_ref, atol=1e-4, rtol=1e-4), "soft mismatch"

    # threshold consistency (exact, against the kernel's own soft output)
    assert jnp.array_equal(hard, (soft >= 0).astype(jnp.float32)), "hard mismatch"

    # 3x3 zero-padded dilation reference from the hard mask
    pad = jnp.pad(hard[:, 0], ((0, 0), (1, 1), (1, 1)))
    dil_ref = sum(pad[:, di:di + H, dj:dj + W]
                  for di in range(3) for dj in range(3)) > 0.5
    assert jnp.array_equal(dil[:, 0], dil_ref), "dilate mismatch"

    # in-kernel active counts
    assert int(m["std"]["active_positions"]) == int(hard.sum())
    assert int(m["dilate"]["active_positions"]) == int(jnp.sum(dil_ref))
    assert m["std"]["total_positions"] == B * H * W


if __name__ == "__main__":
    key = jax.random.PRNGKey(0)
    k1, k2 = jax.random.split(key)
    # Main case: bf16 input, 8 images (Bt=4 -> 2 parallel grid steps),
    # C=16 -> two 8-channel slabs per block.
    _run_case(8, 16, 16, 16, jnp.bfloat16, k1)
    # Small/odd case: f32 input, Bt=1, C=4 (< 8, remainder channel slab).
    _run_case(2, 4, 16, 16, jnp.float32, k2)
    print("KERNEL_OK")
</pallas_src>

<mosaic_0001>
module attributes {stable_mosaic.version = 11 : i64} {
  func.func @_fused_mask_kernel(%arg0: i32, %arg1: i32, %arg2: memref<4x16x256xbf16, #tpu.memory_space<vmem>>, %arg3: memref<16x1xf32, #tpu.memory_space<vmem>>, %arg4: memref<1xf32, #tpu.memory_space<smem>>, %arg5: memref<4x1x256xf32, #tpu.memory_space<vmem>>, %arg6: memref<4x1x256xf32, #tpu.memory_space<vmem>>, %arg7: memref<4x1x256xbf16, #tpu.memory_space<vmem>>, %arg8: memref<1x1x1xf32, #tpu.memory_space<vmem>>, %arg9: memref<1x1x1xf32, #tpu.memory_space<vmem>>, %arg10: memref<4x8x256xf32, #tpu.memory_space<vmem>>) attributes {dimension_semantics = [#tpu.dimension_semantics<parallel>, #tpu.dimension_semantics<arbitrary>], iteration_bounds = array<i64: 2, 1>, scalar_prefetch = 0 : i64, scratch_operands = 1 : i64, tpu.core_type = #tpu.core_type<tc>, window_params = [{transform_indices = @transform_0, window_bounds = array<i64: 4, 16, 256>}, {transform_indices = @transform_1, window_bounds = array<i64: 16, 1>}, {transform_indices = @transform_2, window_bounds = array<i64: 1>}, {transform_indices = @transform_3, window_bounds = array<i64: 4, 1, 256>}, {transform_indices = @transform_4, window_bounds = array<i64: 4, 1, 256>}, {transform_indices = @transform_5, window_bounds = array<i64: 4, 1, 256>}, {transform_indices = @transform_6, window_bounds = array<i64: 1, 1, 1>}, {transform_indices = @transform_7, window_bounds = array<i64: 1, 1, 1>}]} {
    %c0_i32 = arith.constant 0 : i32
    %0 = arith.cmpi eq, %arg1, %c0_i32 : i32
    %1 = arith.extui %0 : i1 to i32
    %c0_i32_0 = arith.constant 0 : i32
    %2 = arith.cmpi ne, %1, %c0_i32_0 : i32
    scf.if %2 {
      %cst = arith.constant 0.000000e+00 : f32
      %24 = vector.broadcast %cst : f32 to vector<4x8x256xf32>
      %c0_23 = arith.constant 0 : index
      %c0_24 = arith.constant 0 : index
      %c0_25 = arith.constant 0 : index
      %25 = vector.load %arg10[%c0_23, %c0_24, %c0_25] : memref<4x8x256xf32, #tpu.memory_space<vmem>>, vector<4x8x256xf32>
      tpu.vector_store %arg10[%c0_23, %c0_24, %c0_25], %24 {strides = array<i32>} : memref<4x8x256xf32, #tpu.memory_space<vmem>>, vector<4x8x256xf32>,
    } else {
    }
    %c0 = arith.constant 0 : index
    %c0_1 = arith.constant 0 : index
    %c0_2 = arith.constant 0 : index
    %3 = vector.load %arg2[%c0, %c0_1, %c0_2] : memref<4x16x256xbf16, #tpu.memory_space<vmem>>, vector<4x8x256xbf16>
    %4 = arith.extf %3 : vector<4x8x256xbf16> to vector<4x8x256xf32>
    %c0_3 = arith.constant 0 : index
    %c0_4 = arith.constant 0 : index
    %5 = vector.load %arg3[%c0_3, %c0_4] : memref<16x1xf32, #tpu.memory_space<vmem>>, vector<8x1xf32>
    %c0_5 = arith.constant 0 : index
    %c0_6 = arith.constant 0 : index
    %c0_7 = arith.constant 0 : index
    %6 = vector.load %arg10[%c0_5, %c0_6, %c0_7] : memref<4x8x256xf32, #tpu.memory_space<vmem>>, vector<4x8x256xf32>
    %7 = vector.shape_cast %5 : vector<8x1xf32> to vector<1x8x1xf32>
    %8 = vector.broadcast %7 : vector<1x8x1xf32> to vector<4x8x256xf32>
    %9 = arith.mulf %4, %8 : vector<4x8x256xf32>
    %10 = arith.addf %6, %9 : vector<4x8x256xf32>
    %c0_8 = arith.constant 0 : index
    %c0_9 = arith.constant 0 : index
    %c0_10 = arith.constant 0 : index
    %11 = vector.load %arg10[%c0_8, %c0_9, %c0_10] : memref<4x8x256xf32, #tpu.memory_space<vmem>>, vector<4x8x256xf32>
    tpu.vector_store %arg10[%c0_8, %c0_9, %c0_10], %10 {strides = array<i32>} : memref<4x8x256xf32, #tpu.memory_space<vmem>>, vector<4x8x256xf32>,
    %c0_11 = arith.constant 0 : index
    %c8 = arith.constant 8 : index
    %c0_12 = arith.constant 0 : index
    %12 = vector.load %arg2[%c0_11, %c8, %c0_12] : memref<4x16x256xbf16, #tpu.memory_space<vmem>>, vector<4x8x256xbf16>
    %13 = arith.extf %12 : vector<4x8x256xbf16> to vector<4x8x256xf32>
    %c8_13 = arith.constant 8 : index
    %c0_14 = arith.constant 0 : index
    %14 = vector.load %arg3[%c8_13, %c0_14] : memref<16x1xf32, #tpu.memory_space<vmem>>, vector<8x1xf32>
    %c0_15 = arith.constant 0 : index
    %c0_16 = arith.constant 0 : index
    %c0_17 = arith.constant 0 : index
    %15 = vector.load %arg10[%c0_15, %c0_16, %c0_17] : memref<4x8x256xf32, #tpu.memory_space<vmem>>, vector<4x8x256xf32>
    %16 = vector.shape_cast %14 : vector<8x1xf32> to vector<1x8x1xf32>
    %17 = vector.broadcast %16 : vector<1x8x1xf32> to vector<4x8x256xf32>
    %18 = arith.mulf %13, %17 : vector<4x8x256xf32>
    %19 = arith.addf %15, %18 : vector<4x8x256xf32>
    %c0_18 = arith.constant 0 : index
    %c0_19 = arith.constant 0 : index
    %c0_20 = arith.constant 0 : index
    %20 = vector.load %arg10[%c0_18, %c0_19, %c0_20] : memref<4x8x256xf32, #tpu.memory_space<vmem>>, vector<4x8x256xf32>
    tpu.vector_store %arg10[%c0_18, %c0_19, %c0_20], %19 {strides = array<i32>} : memref<4x8x256xf32, #tpu.memory_space<vmem>>, vector<4x8x256xf32>,
    %c0_i32_21 = arith.constant 0 : i32
    %21 = arith.cmpi eq, %arg1, %c0_i32_21 : i32
    %22 = arith.extui %21 : i1 to i32
    %c0_i32_22 = arith.constant 0 : i32
    %23 = arith.cmpi ne, %22, %c0_i32_22 : i32
    scf.if %23 {
      %c0_23 = arith.constant 0 : index
      %c0_24 = arith.constant 0 : index
      %c0_25 = arith.constant 0 : index
      %24 = vector.load %arg10[%c0_23, %c0_24, %c0_25] : memref<4x8x256xf32, #tpu.memory_space<vmem>>, vector<4x8x256xf32>
      %cst = arith.constant dense<0.000000e+00> : vector<4x256xf32>
      %25 = vector.multi_reduction <add>, %24, %cst [1] : vector<4x8x256xf32> to vector<4x256xf32>
      %c0_26 = arith.constant 0 : index
      %26 = memref.load %arg4[%c0_26] : memref<1xf32, #tpu.memory_space<smem>>
      %27 = vector.broadcast %26 : f32 to vector<4x256xf32>
      %28 = arith.addf %25, %27 : vector<4x256xf32>
      %c0_27 = arith.constant 0 : index
      %c0_28 = arith.constant 0 : index
      %c0_29 = arith.constant 0 : index
      %29 = vector.load %arg5[%c0_27, %c0_28, %c0_29] : memref<4x1x256xf32, #tpu.memory_space<vmem>>, vector<4x1x256xf32>
      %30 = vector.shape_cast %29 : vector<4x1x256xf32> to vector<4x256xf32>
      %31 = vector.shape_cast %28 : vector<4x256xf32> to vector<4x1x256xf32>
      tpu.vector_store %arg5[%c0_27, %c0_28, %c0_29], %31 {strides = array<i32>} : memref<4x1x256xf32, #tpu.memory_space<vmem>>, vector<4x1x256xf32>,
      %cst_30 = arith.constant 0.000000e+00 : f32
      %32 = vector.broadcast %cst_30 : f32 to vector<4x256xf32>
      %33 = arith.cmpf oge, %28, %32 : vector<4x256xf32>
      %34 = arith.extui %33 : vector<4x256xi1> to vector<4x256xi32>
      %35 = arith.sitofp %34 : vector<4x256xi32> to vector<4x256xf32>
      %c0_31 = arith.constant 0 : index
      %c0_32 = arith.constant 0 : index
      %c0_33 = arith.constant 0 : index
      %36 = vector.load %arg6[%c0_31, %c0_32, %c0_33] : memref<4x1x256xf32, #tpu.memory_space<vmem>>, vector<4x1x256xf32>
      %37 = vector.shape_cast %36 : vector<4x1x256xf32> to vector<4x256xf32>
      %38 = vector.shape_cast %35 : vector<4x256xf32> to vector<4x1x256xf32>
      tpu.vector_store %arg6[%c0_31, %c0_32, %c0_33], %38 {strides = array<i32>} : memref<4x1x256xf32, #tpu.memory_space<vmem>>, vector<4x1x256xf32>,
      %39 = tpu.iota {dimensions = array<i32: 1>} : vector<4x256xi32>
      %c16_i32 = arith.constant 16 : i32
      %c0_i32_34 = arith.constant 0 : i32
      %40 = arith.cmpi eq, %c16_i32, %c0_i32_34 : i32
      %c1_i32 = arith.constant 1 : i32
      %41 = arith.select %40, %c1_i32, %c16_i32 : i32
      %42 = vector.broadcast %41 : i32 to vector<4x256xi32>
      %43 = arith.remsi %39, %42 : vector<4x256xi32>
      %c0_i32_35 = arith.constant 0 : i32
      %44 = vector.broadcast %c0_i32_35 : i32 to vector<4x256xi32>
      %45 = arith.cmpi ne, %43, %44 : vector<4x256xi32>
      %c0_i32_36 = arith.constant 0 : i32
      %46 = vector.broadcast %c0_i32_36 : i32 to vector<4x256xi32>
      %47 = arith.cmpi slt, %43, %46 : vector<4x256xi32>
      %c0_i32_37 = arith.constant 0 : i32
      %48 = arith.cmpi slt, %41, %c0_i32_37 : i32
      %49 = vector.broadcast %48 : i1 to vector<4x256xi1>
      %50 = vector.broadcast %49 : vector<4x256xi1> to vector<4x256xi1>
      %51 = arith.xori %47, %50 : vector<4x256xi1>
      %52 = arith.andi %51, %45 : vector<4x256xi1>
      %53 = vector.broadcast %41 : i32 to vector<4x256xi32>
      %54 = arith.addi %43, %53 : vector<4x256xi32>
      %55 = arith.select %52, %54, %43 : vector<4x256xi1>, vector<4x256xi32>
      %c0_i32_38 = arith.constant 0 : i32
      %56 = vector.broadcast %c0_i32_38 : i32 to vector<4x256xi32>
      %57 = arith.cmpi eq, %55, %56 : vector<4x256xi32>
      %c1_i32_39 = arith.constant 1 : i32
      %58 = tpu.dynamic_rotate %35 by %c1_i32_39 dim 1 : vector<4x256xf32>, i32 -> vector<4x256xf32>
      %cst_40 = arith.constant 0.000000e+00 : f32
      %59 = vector.broadcast %cst_40 : f32 to vector<4x256xf32>
      %60 = arith.select %57, %59, %58 : vector<4x256xi1>, vector<4x256xf32>
      %c15_i32 = arith.constant 15 : i32
      %61 = vector.broadcast %c15_i32 : i32 to vector<4x256xi32>
      %62 = arith.cmpi eq, %55, %61 : vector<4x256xi32>
      %c255_i32 = arith.constant 255 : i32
      %63 = tpu.dynamic_rotate %35 by %c255_i32 dim 1 : vector<4x256xf32>, i32 -> vector<4x256xf32>
      %cst_41 = arith.constant 0.000000e+00 : f32
      %64 = vector.broadcast %cst_41 : f32 to vector<4x256xf32>
      %65 = arith.select %62, %64, %63 : vector<4x256xi1>, vector<4x256xf32>
      %66 = arith.maximumf %60, %65 : vector<4x256xf32>
      %67 = arith.maximumf %35, %66 : vector<4x256xf32>
      %c16_i32_42 = arith.constant 16 : i32
      %68 = vector.broadcast %c16_i32_42 : i32 to vector<4x256xi32>
      %69 = arith.cmpi slt, %39, %68 : vector<4x256xi32>
      %c16_i32_43 = arith.constant 16 : i32
      %70 = tpu.dynamic_rotate %67 by %c16_i32_43 dim 1 : vector<4x256xf32>, i32 -> vector<4x256xf32>
      %cst_44 = arith.constant 0.000000e+00 : f32
      %71 = vector.broadcast %cst_44 : f32 to vector<4x256xf32>
      %72 = arith.select %69, %71, %70 : vector<4x256xi1>, vector<4x256xf32>
      %c240_i32 = arith.constant 240 : i32
      %73 = vector.broadcast %c240_i32 : i32 to vector<4x256xi32>
      %74 = arith.cmpi sge, %39, %73 : vector<4x256xi32>
      %c240_i32_45 = arith.constant 240 : i32
      %75 = tpu.dynamic_rotate %67 by %c240_i32_45 dim 1 : vector<4x256xf32>, i32 -> vector<4x256xf32>
      %cst_46 = arith.constant 0.000000e+00 : f32
      %76 = vector.broadcast %cst_46 : f32 to vector<4x256xf32>
      %77 = arith.select %74, %76, %75 : vector<4x256xi1>, vector<4x256xf32>
      %78 = arith.maximumf %72, %77 : vector<4x256xf32>
      %79 = arith.maximumf %67, %78 : vector<4x256xf32>
      %80 = arith.truncf %79 : vector<4x256xf32> to vector<4x256xbf16>
      %c0_47 = arith.constant 0 : index
      %c0_48 = arith.constant 0 : index
      %c0_49 = arith.constant 0 : index
      %81 = vector.load %arg7[%c0_47, %c0_48, %c0_49] : memref<4x1x256xbf16, #tpu.memory_space<vmem>>, vector<4x1x256xbf16>
      %82 = vector.shape_cast %81 : vector<4x1x256xbf16> to vector<4x256xbf16>
      %83 = vector.shape_cast %80 : vector<4x256xbf16> to vector<4x1x256xbf16>
      tpu.vector_store %arg7[%c0_47, %c0_48, %c0_49], %83 {strides = array<i32>} : memref<4x1x256xbf16, #tpu.memory_space<vmem>>, vector<4x1x256xbf16>,
      %cst_50 = arith.constant dense<0.000000e+00> : vector<4xf32>
      %84 = vector.multi_reduction <add>, %35, %cst_50 [1] : vector<4x256xf32> to vector<4xf32>
      %85 = vector.shape_cast %84 : vector<4xf32> to vector<4x1xf32>
      %cst_51 = arith.constant dense<0.000000e+00> : vector<1xf32>
      %86 = vector.multi_reduction <add>, %85, %cst_51 [0] : vector<4x1xf32> to vector<1xf32>
      %87 = vector.shape_cast %86 : vector<1xf32> to vector<1x1xf32>
      %cst_52 = arith.constant dense<0.000000e+00> : vector<4xf32>
      %88 = vector.multi_reduction <add>, %79, %cst_52 [1] : vector<4x256xf32> to vector<4xf32>
      %89 = vector.shape_cast %88 : vector<4xf32> to vector<4x1xf32>
      %cst_53 = arith.constant dense<0.000000e+00> : vector<1xf32>
      %90 = vector.multi_reduction <add>, %89, %cst_53 [0] : vector<4x1xf32> to vector<1xf32>
      %91 = vector.shape_cast %90 : vector<1xf32> to vector<1x1xf32>
      %92 = vector.shape_cast %87 : vector<1x1xf32> to vector<1x1x1xf32>
      %c0_54 = arith.constant 0 : index
      %c0_55 = arith.constant 0 : index
      %c0_56 = arith.constant 0 : index
      %93 = vector.load %arg8[%c0_54, %c0_55, %c0_56] : memref<1x1x1xf32, #tpu.memory_space<vmem>>, vector<1x1x1xf32>
      tpu.vector_store %arg8[%c0_54, %c0_55, %c0_56], %92 {strides = array<i32>} : memref<1x1x1xf32, #tpu.memory_space<vmem>>, vector<1x1x1xf32>,
      %94 = vector.shape_cast %91 : vector<1x1xf32> to vector<1x1x1xf32>
      %c0_57 = arith.constant 0 : index
      %c0_58 = arith.constant 0 : index
      %c0_59 = arith.constant 0 : index
      %95 = vector.load %arg9[%c0_57, %c0_58, %c0_59] : memref<1x1x1xf32, #tpu.memory_space<vmem>>, vector<1x1x1xf32>
      tpu.vector_store %arg9[%c0_57, %c0_58, %c0_59], %94 {strides = array<i32>} : memref<1x1x1xf32, #tpu.memory_space<vmem>>, vector<1x1x1xf32>,
    } else {
    }
    return
  }
  func.func @transform_0(%arg0: i32, %arg1: i32) -> (i32, i32, i32) {
    %c0_i32 = arith.constant 0 : i32
    %c0_i32_0 = arith.constant 0 : i32
    return %arg0, %arg1, %c0_i32 : i32, i32, i32
  }
  func.func @transform_1(%arg0: i32, %arg1: i32) -> (i32, i32) {
    %c0_i32 = arith.constant 0 : i32
    %c0_i32_0 = arith.constant 0 : i32
    return %arg1, %c0_i32 : i32, i32
  }
  func.func @transform_2(%arg0: i32, %arg1: i32) -> i32 {
    %c0_i32 = arith.constant 0 : i32
    %c0_i32_0 = arith.constant 0 : i32
    return %c0_i32 : i32
  }
  func.func @transform_3(%arg0: i32, %arg1: i32) -> (i32, i32, i32) {
    %c0_i32 = arith.constant 0 : i32
    %c0_i32_0 = arith.constant 0 : i32
    %c0_i32_1 = arith.constant 0 : i32
    return %arg0, %c0_i32, %c0_i32_0 : i32, i32, i32
  }
  func.func @transform_4(%arg0: i32, %arg1: i32) -> (i32, i32, i32) {
    %c0_i32 = arith.constant 0 : i32
    %c0_i32_0 = arith.constant 0 : i32
    %c0_i32_1 = arith.constant 0 : i32
    return %arg0, %c0_i32, %c0_i32_0 : i32, i32, i32
  }
  func.func @transform_5(%arg0: i32, %arg1: i32) -> (i32, i32, i32) {
    %c0_i32 = arith.constant 0 : i32
    %c0_i32_0 = arith.constant 0 : i32
    %c0_i32_1 = arith.constant 0 : i32
    return %arg0, %c0_i32, %c0_i32_0 : i32, i32, i32
  }
  func.func @transform_6(%arg0: i32, %arg1: i32) -> (i32, i32, i32) {
    %c0_i32 = arith.constant 0 : i32
    %c0_i32_0 = arith.constant 0 : i32
    %c0_i32_1 = arith.constant 0 : i32
    return %arg0, %c0_i32, %c0_i32_0 : i32, i32, i32
  }
  func.func @transform_7(%arg0: i32, %arg1: i32) -> (i32, i32, i32) {
    %c0_i32 = arith.constant 0 : i32
    %c0_i32_0 = arith.constant 0 : i32
    %c0_i32_1 = arith.constant 0 : i32
    return %arg0, %c0_i32, %c0_i32_0 : i32, i32, i32
  }
}

</mosaic_0001>

<bundles_post_ra>
// kernel: _mask_unit_kernels.1
= control target key start
LH: loop header
LB: loop body
LE: loop exit
PB: predicated region body
PF: predicated region fallthrough
CT: control target
= control target key end

     0   :  { %s1410_s26 = smov 0   ;;  %s1412_s27 = smov 0   ;;  %s1658_s0 = inlined_call_operand.vmem [shape: bf16[8,16,256], index: 0, kind: input, shape index: {}]   ;;  %s1659_s1 = inlined_call_operand.vmem [shape: f32[16,1], index: 1, kind: input, shape index: {}]   ;;  %s1660_s2 = inlined_call_operand.<no memory space> [shape: f32[1], index: 2, kind: input, shape index: {}]   ;;  %s1661_s3 = inlined_call_operand.vmem [shape: f32[8,1,256], index: 3, kind: output, shape index: {0}]   ;;  %s1662_s4 = inlined_call_operand.vmem [shape: f32[8,1,256], index: 4, kind: output, shape index: {1}]   ;;  %s1663_s5 = inlined_call_operand.vmem [shape: bf16[8,1,256], index: 5, kind: output, shape index: {2}]   ;;  %s1664_s6 = inlined_call_operand.vmem [shape: f32[2,1,1], index: 6, kind: output, shape index: {3}]   ;;  %s1665_s7 = inlined_call_operand.vmem [shape: f32[2,1,1], index: 7, kind: output, shape index: {4}]  }
   0x1   :  { %13 = sst [smem:[#allocation3]] %s1660_s2  ;;  %s1414_s28 = smov 0  }
   0x2 LB: > { %s31_s2 = sadd.s32 1, %s1354_s27  ;;  %p1259_p0 = scmp.ge.s32.totalorder %s1358_s28, 1  ;;  %s1358_s28 = sphi %s1414_s28, %s19_s28   ;;  %s1354_s27 = sphi %s1412_s27, %s1675_s27   ;;  %s1350_s26 = sphi %s1410_s26, %s1674_s26  }
   0x3   : > { %p33_p1 = scmp.ge.s32.totalorder %s31_s2, 2  ;;  %p280_p2 = scmp.lt.s32.totalorder %s1358_s28, 3 }
   0x5   : > { %s1677_s2 = smov (%p33_p1, %s31_s2), 0  ;;  %p281_p3 = pnand %p1259_p0, %p280_p2 }
   0x6   : > { %v406_v0 = vld [vmem:[%s1659_s1] sm:$0xff] (!%p281_p3)  ;;  %v1360_v1 = vmov (!%p281_p3), 0   ;;  %v456_v2 = vld [vmem:[%s1659_s1 + $0x8] sm:$0xff] (!%p281_p3)  ;;  %s1260_s10 = sshll.u32 (!%p281_p3), %s1350_s26, 2  ;;  %s553_s15 = sld [smem:[#allocation3]] (!%p281_p3)  ;;  %v575_v16 = vlaneseq (!%p281_p3)  ;;  %vm772_vm1 = vcmask (!%p281_p3), 1041409  }
   0x7   : > { %284 = sbr.rel (%p281_p3) target bundleno = 594 (0x252), region = 32  ;;  %1315 = vset.pattern.permute.xlu0 (!%p281_p3), %v1360_v1  ;;  %p341_p4 = scmp.lt.s32.totalorder (!%p281_p3), %s1260_s10, 7  ;;  %v1361_v14 = vmov (!%p281_p3), 1966171168   ;;  %vm774_vm8 = vcmask (!%p281_p3), 1042434   ;;  %vm776_vm10 = vcmask (!%p281_p3), 1043459  }
   0x8   : > { %417 = vperm.xlu0 (!%p281_p3), %1315, %v406_v0   ;;  %v1443_v15 = vunpack.c.l.s4 (!%p281_p3), %v1361_v14  ;;  %v1449_v33 = vshrl.u32 (!%p281_p3), %v575_v16, 7  ;;  %vm997_vm11 = vcmask (!%p281_p3), 1043456   ;;  %vm1516_vm12 = vcmp.lt.s32.totalorder (!%p281_p3), %v575_v16, 256  ;;  %s1363_s23 = smov (!%p281_p3), 1   ;;  %s1364_s24 = smov (!%p281_p3), 127  }
   0x9   : > { %s1365_s25 = smov (!%p281_p3), 112   ;;  %s1366_s29 = smov (!%p281_p3), 16  }
   0xa   : > { %v574_v32 = vunpack.c.0.s8 (!%p281_p3), %v1443_v15  ;;  %p376_p5 = scmp.lt.s32.totalorder (!%p281_p3), %s1350_s26, 1 }
   0xc   : > { %467 = vperm.xlu0 (!%p281_p3), %1315, %v456_v2   ;;  %v1445_v31 = vstv (!%p281_p3), %s553_s15 }
   0xe   : > { %s1679_s10 = smov (!%p341_p4, %s1260_s10), 7  ;;  %s1681_s26 = smov (!%p376_p5, %s1350_s26), 1 }
   0xf   : > { %s1283_s11 = sshll.u32 %s1679_s10, 4  ;;  %s1487_s16 = sshll.u32 %s1679_s10, 1 }
  0x10   : > { %s349_s14 = scalar_lea.vmem %s1658_s0, %s1283_s11  ;;  %s362_s19 = scalar_lea.vmem %s1661_s3, %s1487_s16 }
  0x11   : > { %v394_v3 = vld [vmem:[%s349_s14] sm:$0xff]  ;;  %v395_v4 = vld [vmem:[%s349_s14 + $0x10] sm:$0xff]  ;;  %v444_v6 = vld [vmem:[%s349_s14 + $0x8] sm:$0xff]  ;;  %s368_s22 = scalar_lea.vmem %s1662_s4, %s1487_s16  ;;  %s1599_s9 = scalar_lea.vmem %s1663_s5, %s1487_s16 }
  0x12   : > { %v396_v5 = vld [vmem:[%s349_s14 + $0x20] sm:$0xff]  ;;  %v398_v7 = vunpack.c.l.bf16 %v394_v3  ;;  %v445_v8 = vld [vmem:[%s349_s14 + $0x18] sm:$0xff]  ;;  %v397_v9 = vld [vmem:[%s349_s14 + $0x30] sm:$0xff]  ;;  %v399_v10 = vunpack.c.h.bf16 %v394_v3  ;;  %v400_v11 = vunpack.c.l.bf16 %v395_v4  ;;  %v401_v17 = vunpack.c.h.bf16 %v395_v4  ;;  %s378_s12 = scalar_lea.vmem %s1664_s6, %s1681_s26  ;;  %s381_s15 = scalar_lea.vmem %s1665_s7, %s1681_s26 }
  0x13   : > { %v446_v12 = vld [vmem:[%s349_s14 + $0x28] sm:$0xff]  ;;  %v447_v13 = vld [vmem:[%s349_s14 + $0x38] sm:$0xff]  ;;  %v402_v18 = vunpack.c.l.bf16 %v396_v5  ;;  %v403_v19 = vunpack.c.h.bf16 %v396_v5  ;;  %v448_v20 = vunpack.c.l.bf16 %v444_v6  ;;  %v449_v22 = vunpack.c.h.bf16 %v444_v6 }
  0x14   : > { %v450_v23 = vunpack.c.l.bf16 %v445_v8  ;;  %v404_v24 = vunpack.c.l.bf16 %v397_v9  ;;  %v405_v25 = vunpack.c.h.bf16 %v397_v9  ;;  %v451_v26 = vunpack.c.h.bf16 %v445_v8 }
  0x15   : > { %v452_v27 = vunpack.c.l.bf16 %v446_v12  ;;  %v453_v28 = vunpack.c.h.bf16 %v446_v12  ;;  %v454_v29 = vunpack.c.l.bf16 %v447_v13  ;;  %v455_v30 = vunpack.c.h.bf16 %v447_v13 }
  0x87   : > { %v418_v21 = vpop.permute.xlu0 %417 }
  0x88   : > { %v420_v34 = vmul.f32 %v418_v21, %v398_v7  ;;  %v421_v35 = vmul.f32 %v418_v21, %v399_v10  ;;  %v422_v36 = vmul.f32 %v418_v21, %v400_v11  ;;  %v423_v37 = vmul.f32 %v418_v21, %v401_v17 }
  0x89   : > { %v424_v38 = vmul.f32 %v418_v21, %v402_v18  ;;  %v425_v39 = vmul.f32 %v418_v21, %v403_v19  ;;  %v426_v41 = vmul.f32 %v418_v21, %v404_v24  ;;  %v427_v42 = vmul.f32 %v418_v21, %v405_v25 }
  0x8b   : > { %v468_v40 = vpop.permute.xlu0 %467 }
  0x8c   : > { %v470_v43 = vmul.f32 %v468_v40, %v448_v20  ;;  %v471_v44 = vmul.f32 %v468_v40, %v449_v22  ;;  %v472_v45 = vmul.f32 %v468_v40, %v450_v23  ;;  %v473_v46 = vmul.f32 %v468_v40, %v451_v26 }
  0x8d   : > { %v474_v47 = vmul.f32 %v468_v40, %v452_v27  ;;  %v475_v48 = vmul.f32 %v468_v40, %v453_v28  ;;  %v476_v49 = vmul.f32 %v468_v40, %v454_v29  ;;  %v477_v50 = vmul.f32 %v468_v40, %v455_v30 }
  0x8e   : > { %v478_v51 = vadd.f32 %v470_v43, %v420_v34  ;;  %v479_v52 = vadd.f32 %v471_v44, %v421_v35  ;;  %v480_v53 = vadd.f32 %v472_v45, %v422_v36  ;;  %v481_v54 = vadd.f32 %v473_v46, %v423_v37 }
  0x8f   : > { %v482_v55 = vadd.f32 %v474_v47, %v424_v38  ;;  %v483_v56 = vadd.f32 %v475_v48, %v425_v39  ;;  %v484_v57 = vadd.f32 %v476_v49, %v426_v41  ;;  %v485_v58 = vadd.f32 %v477_v50, %v427_v42 }
  0x90   : > { %v505_v59 = vrot.slane %v478_v51, 4  ;;  %v511_v60 = vrot.slane %v479_v52, 4  ;;  %v517_v61 = vrot.slane %v480_v53, 4  ;;  %v523_v62 = vrot.slane %v481_v54, 4 }
  0x91   : > { %v529_v63 = vrot.slane %v482_v55, 4  ;;  %v535_v0 = vrot.slane %v483_v56, 4  ;;  %v541_v1 = vrot.slane %v484_v57, 4  ;;  %v547_v2 = vrot.slane %v485_v58, 4 }
  0x92   : > { %v506_v3 = vadd.f32 %v505_v59, %v478_v51  ;;  %v512_v4 = vadd.f32 %v511_v60, %v479_v52  ;;  %v518_v5 = vadd.f32 %v517_v61, %v480_v53  ;;  %v524_v6 = vadd.f32 %v523_v62, %v481_v54 }
  0x93   : > { %v530_v7 = vadd.f32 %v529_v63, %v482_v55  ;;  %v536_v8 = vadd.f32 %v535_v0, %v483_v56  ;;  %v542_v9 = vadd.f32 %v541_v1, %v484_v57  ;;  %v548_v10 = vadd.f32 %v547_v2, %v485_v58 }
  0x94   : > { %v507_v11 = vrot.slane %v506_v3, 2  ;;  %v513_v12 = vrot.slane %v512_v4, 2  ;;  %v519_v13 = vrot.slane %v518_v5, 2  ;;  %v525_v14 = vrot.slane %v524_v6, 2 }
  0x95   : > { %v531_v17 = vrot.slane %v530_v7, 2  ;;  %v537_v18 = vrot.slane %v536_v8, 2  ;;  %v543_v19 = vrot.slane %v542_v9, 2  ;;  %v549_v20 = vrot.slane %v548_v10, 2 }
  0x96   : > { %v508_v21 = vadd.f32 %v507_v11, %v506_v3  ;;  %v514_v22 = vadd.f32 %v513_v12, %v512_v4  ;;  %v520_v23 = vadd.f32 %v519_v13, %v518_v5  ;;  %v526_v24 = vadd.f32 %v525_v14, %v524_v6 }
  0x97   : > { %v532_v25 = vadd.f32 %v531_v17, %v530_v7  ;;  %v538_v26 = vadd.f32 %v537_v18, %v536_v8  ;;  %v544_v27 = vadd.f32 %v543_v19, %v542_v9  ;;  %v550_v28 = vadd.f32 %v549_v20, %v548_v10 }
  0x98   : > { %v509_v29 = vrot.slane %v508_v21, 1  ;;  %v515_v30 = vrot.slane %v514_v22, 1  ;;  %v521_v34 = vrot.slane %v520_v23, 1  ;;  %v527_v35 = vrot.slane %v526_v24, 1 }
  0x99   : > { %v533_v36 = vrot.slane %v532_v25, 1  ;;  %v539_v37 = vrot.slane %v538_v26, 1  ;;  %v545_v38 = vrot.slane %v544_v27, 1  ;;  %v551_v39 = vrot.slane %v550_v28, 1 }
  0x9a   : > { %v510_v40 = vadd.f32 %v509_v29, %v508_v21  ;;  %v516_v41 = vadd.f32 %v515_v30, %v514_v22  ;;  %v522_v42 = vadd.f32 %v521_v34, %v520_v23  ;;  %v528_v43 = vadd.f32 %v527_v35, %v526_v24 }
  0x9b   : > { %v534_v44 = vadd.f32 %v533_v36, %v532_v25  ;;  %v540_v45 = vadd.f32 %v539_v37, %v538_v26  ;;  %v546_v46 = vadd.f32 %v545_v38, %v544_v27  ;;  %v552_v47 = vadd.f32 %v551_v39, %v550_v28 }
  0x9c   : > { %v555_v48 = vadd.f32 %v1445_v31, %v510_v40  ;;  %v556_v49 = vadd.f32 %v1445_v31, %v516_v41  ;;  %v557_v50 = vadd.f32 %v1445_v31, %v522_v42  ;;  %v558_v51 = vadd.f32 %v1445_v31, %v528_v43 }
  0x9d   : > { %v559_v52 = vadd.f32 %v1445_v31, %v534_v44  ;;  %v560_v53 = vadd.f32 %v1445_v31, %v540_v45  ;;  %v561_v54 = vadd.f32 %v1445_v31, %v546_v46  ;;  %v562_v55 = vadd.f32 %v1445_v31, %v552_v47 }
  0x9e   : > { %v1462_v56 = vsub.s32 %v574_v32, %v1449_v33  ;;  %vm643_vm0 = vcmp.ge.f32.partialorder %v555_v48, 0.0  ;;  %vm644_vm2 = vcmp.ge.f32.partialorder %v556_v49, 0.0  ;;  %vm645_vm3 = vcmp.ge.f32.partialorder %v557_v50, 0.0 }
  0x9f   : > { %vm646_vm4 = vcmp.ge.f32.partialorder %v558_v51, 0.0  ;;  %vm647_vm5 = vcmp.ge.f32.partialorder %v559_v52, 0.0  ;;  %v586_v57 = vcombine.low %v557_v50, %v558_v51  ;;  %vm648_vm6 = vcmp.ge.f32.partialorder %v560_v53, 0.0 }
  0xa0   : > { %vm649_vm7 = vcmp.ge.f32.partialorder %v561_v54, 0.0  ;;  %vm650_vm9 = vcmp.ge.f32.partialorder %v562_v55, 0.0  ;;  %v1362_v58 = vmov 0.0   ;;  %v601_v60 = vcombine.low %v559_v52, %v560_v53 }
  0xa1   : > { %v1464_v59 = vsel %vm643_vm0, 1.0, %v1362_v58  ;;  %v1466_v15 = vsel %vm644_vm2, 1.0, %v1362_v58  ;;  %v1468_v31 = vsel %vm645_vm3, 1.0, %v1362_v58  ;;  %v1470_v32 = vsel %vm646_vm4, 1.0, %v1362_v58 }
  0xa2   : > { %v1472_v33 = vsel %vm647_vm5, 1.0, %v1362_v58  ;;  %v616_v61 = vcombine.low %v561_v54, %v562_v55  ;;  %v1474_v62 = vsel %vm648_vm6, 1.0, %v1362_v58  ;;  %v1476_v63 = vsel %vm649_vm7, 1.0, %v1362_v58 }
  0xa3   : > { %v593_v0 = vrot.slane %v586_v57, %v1462_v56  ;;  %v1479_v1 = vsel %vm650_vm9, 1.0, %v1362_v58  ;;  %v690_v2 = vcombine.low %v1468_v31, %v1470_v32  ;;  %v773_v3 = vsel %vm772_vm1, %v1468_v31, %v1464_v59 }
  0xa4   : > { %v705_v4 = vcombine.low %v1472_v33, %v1474_v62  ;;  %v775_v5 = vsel %vm774_vm8, %v1472_v33, %v773_v3  ;;  %v778_v6 = vsel %vm772_vm1, %v1470_v32, %v1466_v15  ;;  %v571_v7 = vcombine.low %v555_v48, %v556_v49 }
  0xa5   : > { %v697_v8 = vrot.slane %v690_v2, %v1462_v56  ;;  %v720_v9 = vcombine.low %v1476_v63, %v1479_v1  ;;  %v777_v10 = vsel %vm776_vm10, %v1476_v63, %v775_v5  ;;  %v779_v11 = vsel %vm774_vm8, %v1474_v62, %v778_v6 }
  0xa6   : > { %v608_v12 = vrot.slane %v601_v60, %v1462_v56  ;;  %v780_v13 = vsel %vm776_vm10, %v1479_v1, %v779_v11  ;;  %v578_v14 = vrot.slane %v571_v7, %v1462_v56  ;;  %v675_v17 = vcombine.low %v1464_v59, %v1466_v15 }
  0xa7   : > { %v600_v18 = vrot.slane %v593_v0, %v1462_v56  ;;  %v623_v19 = vrot.slane %v616_v61, %v1462_v56  ;;  %v1316_v21 = vpack.i.bf16 %v780_v13, %v777_v10  ;;  %v712_v22 = vrot.slane %v705_v4, %v1462_v56 }
  0xa8   : > { %v585_v23 = vrot.slane %v578_v14, %v1462_v56  ;;  %v682_v24 = vrot.slane %v675_v17, %v1462_v56  ;;  %v704_v25 = vrot.slane %v697_v8, %v1462_v56  ;;  %v727_v26 = vrot.slane %v720_v9, %v1462_v56 }
  0xa9   : > { %1317 = vrot.lane.b32.xlu1 %v1316_v21, %s1363_s23  ;;  %v998_v27 = vsel %vm997_vm11, %v777_v10, 0.0  ;;  %v999_v28 = vsel %vm997_vm11, %v780_v13, 0.0  ;;  %v615_v29 = vrot.slane %v608_v12, %v1462_v56  ;;  %v630_v35 = vrot.slane %v623_v19, %v1462_v56  ;;  %640 = vst.msk [vmem:[%s362_s19 + $0x2] sm:$0x3] %vm1516_vm12, %v600_v18 }
  0xaa   : > { %639 = vst.msk [vmem:[%s362_s19] sm:$0x3] %vm1516_vm12, %v585_v23  ;;  %v689_v30 = vrot.slane %v682_v24, %v1462_v56  ;;  %v1535_v34 = vadd.f32 %v999_v28, %v998_v27  ;;  %v719_v36 = vrot.slane %v712_v22, %v1462_v56  ;;  %v734_v37 = vrot.slane %v727_v26, %v1462_v56 }
  0xab   : > { %641 = vst.msk [vmem:[%s362_s19 + $0x4] sm:$0x3] %vm1516_vm12, %v615_v29  ;;  %642 = vst.msk [vmem:[%s362_s19 + $0x6] sm:$0x3] %vm1516_vm12, %v630_v35  ;;  %v1555_v38 = vand.u32 127, %v575_v16  ;;  %vm978_vm7 = vcmask 1040384  }
  0xac   : > { %739 = vst.msk [vmem:[%s368_s22] sm:$0x3] %vm1516_vm12, %v689_v30  ;;  %740 = vst.msk [vmem:[%s368_s22 + $0x2] sm:$0x3] %vm1516_vm12, %v704_v25  ;;  %vm979_vm9 = vsmask.f32 256 }
  0xad   : > { %1322 = vrot.lane.b32.xlu1 %v1316_v21, %s1364_s24  ;;  %741 = vst.msk [vmem:[%s368_s22 + $0x4] sm:$0x3] %vm1516_vm12, %v719_v36  ;;  %742 = vst.msk [vmem:[%s368_s22 + $0x6] sm:$0x3] %vm1516_vm12, %v734_v37  ;;  %v1558_v39 = vadd.s32 128, %v1555_v38  ;;  %v750_v40 = vand.u32 15, %v1555_v38 }
  0xae   : > { %vm787_vm13 = vcmp.lt.s32.totalorder %v1555_v38, 1  ;;  %vm798_vm3 = vcmp.lt.s32.totalorder %v1555_v38, 127  ;;  %vm867_vm5 = vcmp.lt.s32.totalorder %v1555_v38, 112  ;;  %vm829_vm6 = vcmp.lt.s32.totalorder %v1555_v38, 16 }
  0xaf   : > { %v757_v41 = vand.u32 15, %v1558_v39  ;;  %vm1563_vm14 = vcmp.eq.s32.totalorder %v750_v40, 0  ;;  %vm792_vm0 = vcmp.eq.s32.totalorder %v750_v40, 15  ;;  %vm862_vm4 = vcmp.ge.s32.totalorder %v1558_v39, 240 }
  0xb0   : > { %vm982_vm12 = vsmask.f32 1280 }
  0xb1   : > { %vm1567_vm15 = vcmp.eq.s32.totalorder %v757_v41, 0  ;;  %vm793_vm2 = vcmp.eq.s32.totalorder %v757_v41, 15 }
 0x11b   : > { %v1318_v42 = vpop.permute.xlu1 %1317 }
 0x11c   : > { %v1320_v43 = vunpack.i.h.bf16 %v1318_v42  ;;  %v1319_v44 = vunpack.i.l.bf16 %v1318_v42 }
 0x11e   : > { %v788_v47 = vsel %vm787_vm13, %v1319_v44, %v1320_v43  ;;  %v789_v48 = vsel %vm787_vm13, %v1320_v43, %v1319_v44  ;;  %vm980_vm13 = vmand %vm978_vm7, %vm979_vm9 }
 0x11f   : > { %v1323_v16 = vpop.permute.xlu1 %1322  ;;  %v790_v53 = vsel %vm1563_vm14, 0.0, %v789_v48  ;;  %v791_v54 = vsel %vm1567_vm15, 0.0, %v788_v47  ;;  %vm983_vm14 = vmand %vm772_vm1, %vm982_vm12 }
 0x120   : > { %v1325_v49 = vunpack.i.h.bf16 %v1323_v16  ;;  %v1324_v50 = vunpack.i.l.bf16 %v1323_v16  ;;  %vm1604_vm15 = vmor %vm983_vm14, %vm980_vm13 }
 0x122   : > { %v799_v51 = vsel %vm798_vm3, %v1324_v50, %v1325_v49  ;;  %v800_v52 = vsel %vm798_vm3, %v1325_v49, %v1324_v50 }
 0x123   : > { %v801_v55 = vsel %vm792_vm0, 0.0, %v799_v51  ;;  %v802_v57 = vsel %vm793_vm2, 0.0, %v800_v52 }
 0x124   : > { %v803_v58 = vmax.f32 %v790_v53, %v801_v55  ;;  %v804_v60 = vmax.f32 %v791_v54, %v802_v57 }
 0x126   : > { %v807_v61 = vrot.slane %v803_v58, 1  ;;  %v808_v0 = vrot.slane %v804_v60, 1  ;;  %v809_v2 = vrot.slane %v803_v58, 2  ;;  %v810_v3 = vrot.slane %v804_v60, 2 }
 0x127   : > { %v811_v4 = vrot.slane %v803_v58, 3  ;;  %v812_v5 = vrot.slane %v804_v60, 3  ;;  %v821_v10 = vmax.f32 %v1464_v59, %v803_v58  ;;  %v822_v11 = vmax.f32 %v1466_v15, %v804_v60  ;;  %v985_v60 = vld [vmem:[%s1599_s9] sm:$0x3] }
 0x128   : > { %v823_v6 = vmax.f32 %v1468_v31, %v807_v61  ;;  %v824_v7 = vmax.f32 %v1470_v32, %v808_v0  ;;  %v825_v8 = vmax.f32 %v1472_v33, %v809_v2  ;;  %v826_v9 = vmax.f32 %v1474_v62, %v810_v3 }
 0x129   : > { %v827_v12 = vmax.f32 %v1476_v63, %v811_v4  ;;  %v828_v13 = vmax.f32 %v1479_v1, %v812_v5 }
 0x12a   : > { %v839_v14 = vrot.slane %v823_v6, 7  ;;  %v841_v17 = vrot.slane %v825_v8, 6  ;;  %v845_v18 = vrot.slane %v824_v7, 7  ;;  %v847_v19 = vrot.slane %v826_v9, 6 }
 0x12b   : > { %v843_v20 = vrot.slane %v827_v12, 5  ;;  %v849_v33 = vrot.slane %v828_v13, 5 }
 0x12c   : > { %v840_v31 = vsel %vm772_vm1, %v839_v14, %v821_v10  ;;  %v846_v32 = vsel %vm772_vm1, %v845_v18, %v822_v11 }
 0x12d   : > { %v842_v62 = vsel %vm774_vm8, %v841_v17, %v840_v31  ;;  %v848_v59 = vsel %vm774_vm8, %v847_v19, %v846_v32  ;;  %v988_v19 = vld [vmem:[%s1599_s9 + $0x2] sm:$0x3] }
 0x12e   : > { %v844_v15 = vsel %vm776_vm10, %v843_v20, %v842_v62  ;;  %v850_v63 = vsel %vm776_vm10, %v849_v33, %v848_v59  ;;  %v991_v62 = vld [vmem:[%s1599_s9 + $0x4] sm:$0x3] }
 0x12f   : > { %v1331_v21 = vpack.i.bf16 %v850_v63, %v844_v15 }
 0x131   : > { %1332 = vrot.lane.b32.xlu1 %v1331_v21, %s1365_s25  ;;  %1327 = vrot.lane.b32.xlu0 %v1331_v21, %s1366_s29  ;;  %v994_v21 = vld [vmem:[%s1599_s9 + $0x6] sm:$0x3] }
 0x150   : > { %1001 = vadd.xlane.f32.xlu0 %v1535_v34 }
 0x1a3   : > { %v1333_v1 = vpop.permute.xlu1 %1332  ;;  %v1328_v22 = vpop.permute.xlu0 %1327 }
 0x1a4   : > { %v1335_v23 = vunpack.i.h.bf16 %v1333_v1  ;;  %v1334_v24 = vunpack.i.l.bf16 %v1333_v1  ;;  %v1330_v25 = vunpack.i.h.bf16 %v1328_v22  ;;  %v1329_v26 = vunpack.i.l.bf16 %v1328_v22 }
 0x1a6   : > { %v868_v27 = vsel %vm867_vm5, %v1334_v24, %v1335_v23  ;;  %v869_v28 = vsel %vm867_vm5, %v1335_v23, %v1334_v24  ;;  %v857_v29 = vsel %vm829_vm6, %v1329_v26, %v1330_v25  ;;  %v858_v30 = vsel %vm829_vm6, %v1330_v25, %v1329_v26 }
 0x1a7   : > { %v871_v35 = vsel %vm862_vm4, 0.0, %v869_v28  ;;  %v859_v36 = vsel %vm829_vm6, 0.0, %v858_v30 }
 0x1a8   : > { %v872_v37 = vmax.f32 %v859_v36, %v868_v27  ;;  %v873_v34 = vmax.f32 %v857_v29, %v871_v35 }
 0x1aa   : > { %v876_v39 = vrot.slane %v872_v37, 1  ;;  %v877_v40 = vrot.slane %v873_v34, 1  ;;  %v878_v38 = vrot.slane %v872_v37, 2  ;;  %v879_v41 = vrot.slane %v873_v34, 2 }
 0x1ab   : > { %v880_v42 = vrot.slane %v872_v37, 3  ;;  %v881_v43 = vrot.slane %v873_v34, 3  ;;  %v890_v44 = vmax.f32 %v821_v10, %v872_v37  ;;  %v891_v45 = vmax.f32 %v822_v11, %v873_v34 }
 0x1ac   : > { %v892_v46 = vmax.f32 %v823_v6, %v876_v39  ;;  %v893_v16 = vmax.f32 %v824_v7, %v877_v40  ;;  %v894_v47 = vmax.f32 %v825_v8, %v878_v38  ;;  %v895_v48 = vmax.f32 %v826_v9, %v879_v41 }
 0x1ad   : > { %v896_v49 = vmax.f32 %v827_v12, %v880_v42  ;;  %v897_v50 = vmax.f32 %v828_v13, %v881_v43  ;;  %v1277_v51 = vpack.c.bf16 %v891_v45, %v890_v44 }
 0x1ae   : > { %v1018_v52 = vrot.slane %v892_v46, 7  ;;  %v1020_v53 = vrot.slane %v894_v47, 6  ;;  %v1024_v54 = vrot.slane %v893_v16, 7  ;;  %v1026_v57 = vrot.slane %v895_v48, 6 }
 0x1af   : > { %v921_v55 = vrot.slane %v1277_v51, %v1462_v56  ;;  %v1022_v0 = vrot.slane %v896_v49, 5  ;;  %v1028_v3 = vrot.slane %v897_v50, 5  ;;  %v1278_v9 = vpack.c.bf16 %v893_v16, %v892_v46 }
 0x1b0   : > { %v1019_v61 = vsel %vm772_vm1, %v1018_v52, %v890_v44  ;;  %v1025_v2 = vsel %vm772_vm1, %v1024_v54, %v891_v45  ;;  %v1279_v18 = vpack.c.bf16 %v895_v48, %v894_v47  ;;  %v1280_v33 = vpack.c.bf16 %v897_v50, %v896_v49 }
 0x1b1   : > { %v928_v4 = vrot.slane %v921_v55, %v1462_v56  ;;  %v1021_v5 = vsel %vm774_vm8, %v1020_v53, %v1019_v61  ;;  %v1027_v6 = vsel %vm774_vm8, %v1026_v57, %v1025_v2  ;;  %v936_v14 = vrot.slane %v1278_v9, %v1462_v56 }
 0x1b2   : > { %v1023_v7 = vsel %vm776_vm10, %v1022_v0, %v1021_v5  ;;  %v1029_v8 = vsel %vm776_vm10, %v1028_v3, %v1027_v6  ;;  %v951_v20 = vrot.slane %v1279_v18, %v1462_v56  ;;  %v966_v15 = vrot.slane %v1280_v33, %v1462_v56 }
 0x1b3   : > { %v986_v10 = vsel %vm1604_vm15, %v928_v4, %v985_v60  ;;  %v1032_v11 = vsel %vm997_vm11, %v1023_v7, 0.0  ;;  %v1033_v12 = vsel %vm997_vm11, %v1029_v8, 0.0  ;;  %v943_v17 = vrot.slane %v936_v14, %v1462_v56 }
 0x1b4   : > { %987 = vst [vmem:[%s1599_s9] sm:$0x3] %v986_v10  ;;  %v1034_v13 = vadd.f32 %v1033_v12, %v1032_v11  ;;  %v958_v32 = vrot.slane %v951_v20, %v1462_v56  ;;  %v973_v63 = vrot.slane %v966_v15, %v1462_v56  ;;  %vm1044_vm1 = vcmask 0  }
 0x1b5   : > { %v989_v31 = vsel %vm1604_vm15, %v943_v17, %v988_v19 }
 0x1b6   : > { %1035 = vadd.xlane.f32.xlu1 %v1034_v13  ;;  %990 = vst [vmem:[%s1599_s9 + $0x2] sm:$0x3] %v989_v31  ;;  %v992_v59 = vsel %vm1604_vm15, %v958_v32, %v991_v62  ;;  %v995_v1 = vsel %vm1604_vm15, %v973_v63, %v994_v21 }
 0x1b7   : > { %993 = vst [vmem:[%s1599_s9 + $0x4] sm:$0x3] %v992_v59  ;;  %996 = vst [vmem:[%s1599_s9 + $0x6] sm:$0x3] %v995_v1 }
 0x1dd   : > { %v1002_v22 = vpop.xlane.xlu0 %1001 }
 0x1de   : > { %v1003_v23 = vsel %vm997_vm11, %v1002_v22, 0.0 }
 0x1df   : > { %v1004_v24 = vrot.slane %v1003_v23, 4 }
 0x1e1   : > { %v1005_v25 = vadd.f32 %v1004_v24, %v1003_v23 }
 0x1e3   : > { %v1006_v26 = vrot.slane %v1005_v25, 2 }
 0x1e5   : > { %v1007_v27 = vadd.f32 %v1006_v26, %v1005_v25 }
 0x1e7   : > { %v1008_v28 = vrot.slane %v1007_v27, 1 }
 0x1e9   : > { %v1009_v56 = vadd.f32 %v1008_v28, %v1007_v27 }
 0x1eb   : > { %1045 = vst.msk [vmem:[%s378_s12] sm:$0x1] %vm1044_vm1, %v1009_v56 }
 0x243   : > { %v1036_v29 = vpop.xlane.xlu1 %1035 }
 0x244   : > { %v1037_v30 = vsel %vm997_vm11, %v1036_v29, 0.0 }
 0x245   : > { %v1038_v35 = vrot.slane %v1037_v30, 4 }
 0x247   : > { %v1039_v36 = vadd.f32 %v1038_v35, %v1037_v30 }
 0x249   : > { %v1040_v37 = vrot.slane %v1039_v36, 2 }
 0x24b   : > { %v1041_v34 = vadd.f32 %v1040_v37, %v1039_v36 }
 0x24d   : > { %v1042_v39 = vrot.slane %v1041_v34, 1 }
 0x24f   : > { %v1043_v40 = vadd.f32 %v1042_v39, %v1041_v34 }
 0x251   : > { %1046 = vst.msk [vmem:[%s381_s15] sm:$0x1] %vm1044_vm1, %v1043_v40 }
 0x252 PF: > { %s19_s28 = sadd.s32 1, %s1358_s28   ;;  %s1674_s26 = smov %s1354_s27 }
 0x253   : > { %p16_p6 = scmp.ge.s32.totalorder %s19_s28, 4   ;;  %s1675_s27 = smov %s1677_s2 }
 0x255   :  { %18 = sbr.rel (!%p16_p6) target bundleno = 2 (0x2), region = 121 }

</bundles_post_ra>
